<compile_context>
chip_gen: v6e
topology: v6e:2x2x1
jax: 0.10.0
libtpu: 0.0.40
codegen_flags: <defaults>
</compile_context>

<pallas_src>
import jax
import jax.numpy as jnp
from jax.experimental import pallas as pl
from jax.experimental.pallas import tpu as pltpu


# ---------------- Pallas kernel ----------------
def kan_kernel(x_ref, w_ref, o_ref):
    x = x_ref[...]                                        # (TM, IN)  f32
    # silu(x) in f32; exp + approx-reciprocal run on the EUP slot (frees VALU).
    xb = x * pl.reciprocal(1.0 + jnp.exp(-x), approx=True)
    # Fused operand: [silu(x) | x]  -> (TM, 2*IN); lane concat of two half-width
    # tiles, then cast once to the matmul dtype (bf16 by default).
    zcat = jnp.concatenate([xb, x], axis=-1).astype(w_ref.dtype)
    # Single MXU contraction against the pre-transposed fused weight (2*IN, TN),
    # f32 accumulation; result is zb + zs directly.
    o_ref[...] = jnp.dot(zcat, w_ref[...],
                         preferred_element_type=jnp.float32).astype(o_ref.dtype)


def _round_up(a: int, m: int) -> int:
    return (a + m - 1) // m * m


def kan_layer(x, wb, ws, *, tm=None, tn=None, matmul_dtype=jnp.bfloat16):
    """x: (B, IN) f32;  wb: (OUT, IN);  ws: (OUT, IN, GK).  Returns (B, OUT)."""
    B, IN = x.shape
    OUT = wb.shape[0]
    assert wb.shape == (OUT, IN) and ws.shape[:2] == (OUT, IN)

    # --- Grid-invariant prep hoisted out of the kernel (runs once, not B//tm times) ---
    # Spline-basis reduction: zs = x @ ws.sum(-1).T.  GK is the contiguous minor dim,
    # so this is cheap here and removes the lane-sparse (GK=8 -> 128 lanes) tile from VMEM.
    ws_eff = jnp.sum(ws, axis=-1)                         # (OUT, IN)
    # Fused + pre-transposed weight: (2*IN, OUT), lane-dense in OUT, no in-kernel .T.
    w_cat = jnp.concatenate([wb, ws_eff], axis=1).T.astype(matmul_dtype)

    # --- Tiling (large batch tiles; lane-dense OUT tiles) ---
    if tm is None:
        tm = min(256, _round_up(B, 8))                    # fill MXU rows, >=8 sublanes
    if tn is None:
        tn = min(512, _round_up(OUT, 128))                # lane-dense output stores
    B_pad = _round_up(B, tm)
    OUT_pad = _round_up(OUT, tn)

    if B_pad != B:
        x = jnp.pad(x, ((0, B_pad - B), (0, 0)))
    if OUT_pad != OUT:
        w_cat = jnp.pad(w_cat, ((0, 0), (0, OUT_pad - OUT)))

    n_bt = B_pad // tm
    n_ot = OUT_pad // tn

    # OUT tiles on the OUTER axis so the resident weight tile only changes n_ot times;
    # both axes are "parallel" for megacore sharding.
    # NOTE: for very large resident weights, additionally request single buffering on
    # the weight BlockSpec (pipeline_mode=pl.Buffered(1)) and set vmem_limit_bytes —
    # unnecessary at these demo sizes.
    out = pl.pallas_call(
        kan_kernel,
        out_shape=jax.ShapeDtypeStruct((B_pad, OUT_pad), x.dtype),
        grid=(n_ot, n_bt),
        in_specs=[
            pl.BlockSpec((tm, IN), lambda j, i: (i, 0)),        # x tile (streams over batch)
            pl.BlockSpec((2 * IN, tn), lambda j, i: (0, j)),    # fused weight tile
        ],
        out_specs=pl.BlockSpec((tm, tn), lambda j, i: (i, j)),
        compiler_params=pltpu.CompilerParams(
            dimension_semantics=("parallel", "parallel")),
    )(x, w_cat)

    return out[:B, :OUT]


# ---------------- deterministic parameter init (matches __init__ shapes) ----------------
def init_params(key, in_features, out_features, grid_size, spline_order):
    # wb: xavier_uniform_ over (out_features, in_features)
    bound = (6.0 / (in_features + out_features)) ** 0.5
    wb = jax.random.uniform(key, (out_features, in_features),
                            minval=-bound, maxval=bound, dtype=jnp.float32)
    # ws: torch.ones(out_features, in_features, grid_size + spline_order)
    ws = jnp.ones((out_features, in_features, grid_size + spline_order), jnp.float32)
    return wb, ws


def reference(x, wb, ws):
    zb = jnp.dot(jax.nn.silu(x), wb.T)
    zs = jnp.dot(x, jnp.sum(ws, axis=-1).T)
    return zb + zs


if __name__ == "__main__":
    in_features, out_features = 64, 128
    grid_size, spline_order = 5, 3
    batch = 16

    key = jax.random.PRNGKey(0)
    kx, kw = jax.random.split(key)
    x = jax.random.normal(kx, (batch, in_features), dtype=jnp.float32)
    wb, ws = init_params(kw, in_features, out_features, grid_size, spline_order)

    out = kan_layer(x, wb, ws)
    out = jax.block_until_ready(out)

    ref = reference(x, wb, ws)
    assert out.shape == (batch, out_features)
    # bf16 matmul operands with f32 accumulation -> relaxed tolerance vs. f32 reference.
    assert jnp.allclose(out, ref, atol=5e-1, rtol=2e-2), float(jnp.abs(out - ref).max())

    print("KERNEL_OK")
</pallas_src>

<mosaic_0001>
module attributes {stable_mosaic.version = 11 : i64} {
  func.func @kan_kernel(%arg0: i32, %arg1: i32, %arg2: memref<16x64xf32, #tpu.memory_space<vmem>>, %arg3: memref<128x128xbf16, #tpu.memory_space<vmem>>, %arg4: memref<16x128xf32, #tpu.memory_space<vmem>>) attributes {dimension_semantics = [#tpu.dimension_semantics<parallel>, #tpu.dimension_semantics<parallel>], iteration_bounds = array<i64: 1, 1>, scalar_prefetch = 0 : i64, scratch_operands = 0 : i64, tpu.core_type = #tpu.core_type<tc>, window_params = [{transform_indices = @transform_0, window_bounds = array<i64: 16, 64>}, {transform_indices = @transform_1, window_bounds = array<i64: 128, 128>}, {transform_indices = @transform_2, window_bounds = array<i64: 16, 128>}]} {
    %c0 = arith.constant 0 : index
    %c0_0 = arith.constant 0 : index
    %0 = vector.load %arg2[%c0, %c0_0] : memref<16x64xf32, #tpu.memory_space<vmem>>, vector<16x64xf32>
    %cst = arith.constant 0.000000e+00 : f32
    %1 = vector.broadcast %cst : f32 to vector<16x64xf32>
    %2 = arith.subf %1, %0 : vector<16x64xf32>
    %3 = math.exp %2 : vector<16x64xf32>
    %cst_1 = arith.constant 1.000000e+00 : f32
    %4 = vector.broadcast %cst_1 : f32 to vector<16x64xf32>
    %5 = arith.addf %4, %3 : vector<16x64xf32>
    %6 = tpu.reciprocal %5 {approx = true} : vector<16x64xf32> -> vector<16x64xf32>
    %7 = arith.mulf %0, %6 : vector<16x64xf32>
    %8 = tpu.concatenate %7, %0 in 1 : vector<16x64xf32>, vector<16x64xf32> -> vector<16x128xf32>
    %9 = arith.truncf %8 : vector<16x128xf32> to vector<16x128xbf16>
    %c0_2 = arith.constant 0 : index
    %c0_3 = arith.constant 0 : index
    %10 = vector.load %arg3[%c0_2, %c0_3] : memref<128x128xbf16, #tpu.memory_space<vmem>>, vector<128x128xbf16>
    %cst_4 = arith.constant dense<0.000000e+00> : vector<16x128xf32>
    %11 = tpu.matmul %9, %10, %cst_4 {dimension_numbers = #tpu.dot_dimension_numbers<[1], [0], [0], [1], [0, 0, 1, 1], [], []>} : vector<16x128xbf16>, vector<128x128xbf16>, vector<16x128xf32> -> vector<16x128xf32>
    %c0_5 = arith.constant 0 : index
    %c0_6 = arith.constant 0 : index
    %12 = vector.load %arg4[%c0_5, %c0_6] : memref<16x128xf32, #tpu.memory_space<vmem>>, vector<16x128xf32>
    tpu.vector_store %arg4[%c0_5, %c0_6], %11 {strides = array<i32>} : memref<16x128xf32, #tpu.memory_space<vmem>>, vector<16x128xf32>,
    return
  }
  func.func @transform_0(%arg0: i32, %arg1: i32) -> (i32, i32) {
    %c0_i32 = arith.constant 0 : i32
    %c0_i32_0 = arith.constant 0 : i32
    return %arg1, %c0_i32 : i32, i32
  }
  func.func @transform_1(%arg0: i32, %arg1: i32) -> (i32, i32) {
    %c0_i32 = arith.constant 0 : i32
    %c0_i32_0 = arith.constant 0 : i32
    return %c0_i32, %arg0 : i32, i32
  }
  func.func @transform_2(%arg0: i32, %arg1: i32) -> (i32, i32) {
    %c0_i32 = arith.constant 0 : i32
    return %arg1, %arg0 : i32, i32
  }
}

</mosaic_0001>

<bundles_post_ra>
// kernel: tpu_custom_call.1
= control target key start
LH: loop header
LB: loop body
LE: loop exit
PB: predicated region body
PF: predicated region fallthrough
CT: control target
= control target key end

     0   :  { %7 = vsyncpa [#allocation3], 0  ;;  %s364_s0 = inlined_call_operand.hbm [shape: f32[16,64], index: 0, kind: input, shape index: {}]   ;;  %s365_s1 = inlined_call_operand.hbm [shape: bf16[128,128], index: 1, kind: input, shape index: {}]   ;;  %s366_s2 = inlined_call_operand.hbm [shape: f32[16,128], index: 2, kind: output, shape index: {}]  }
   0x1   :  { %8 = vsyncpa [#allocation6], 0 }
   0x2   :  { %9 = vsyncpa [#allocation4], 0  ;;  %s325_s9 = smov [#allocation2]  }
   0x3   :  { %s15_s10 = sshll.u32 %s325_s9, 4  ;;  %s16_s10 = int_to_ptr.vmem [resolvable:$true] %s15_s10 }
   0x4   :  { %s267_s11 = scalar_lea.vmem %s16_s10, 256  ;;  %p272_p1 = scmp.lt.s32.totalorder %s16_s10, %s16_s10 }
   0x5   :  { %p268_p0 = scmp.ne.s32.totalorder %s16_s10, %s267_s11  ;;  %p273_p2 = scmp.lt.s32.totalorder %s267_s11, %s267_s11 }
   0x7   :  { %p274_p3 = por %p273_p2, %p272_p1 }
   0x9   :  { %p275_p4 = pnand %p274_p3, %p268_p0 }
   0xb   :  { %278 = shalt.err (!%p275_p4)
}
   0xc   :  { %s326_s12 = smov 128   ;;  %s327_s13 = smov 8  }
   0xd   :  { %21 = dma.hbm_to_vmem [thread:$0]  %s364_s0, 256, %s16_s10, [#allocation3], %s326_s12, %s326_s12, %s327_s13  }
   0xe   :  { %s328_s16 = smov [#allocation5]  }
   0xf   :  { %s27_s17 = sshll.u32 %s328_s16, 4  ;;  %s28_s17 = int_to_ptr.vmem [resolvable:$true] %s27_s17 }
  0x10   :  { %s287_s18 = scalar_lea.vmem %s28_s17, 1024  ;;  %p292_p6 = scmp.lt.s32.totalorder %s28_s17, %s28_s17 }
  0x11   :  { %p288_p5 = scmp.ne.s32.totalorder %s28_s17, %s287_s18  ;;  %p293_p7 = scmp.lt.s32.totalorder %s287_s18, %s287_s18 }
  0x13   :  { %p294_p8 = por %p293_p7, %p292_p6 }
  0x15   :  { %p295_p9 = pnand %p294_p8, %p288_p5 }
  0x17   :  { %298 = shalt.err (!%p295_p9)
}
  0x18   :  { %s329_s19 = smov 64   ;;  %s330_s20 = smov 4  }
  0x19   :  { %33 = dma.hbm_to_vmem [thread:$0]  %s365_s1, 1024, %s28_s17, [#allocation6], %s329_s19, %s329_s19, %s330_s20  }
  0x1a   :  { %319 = dma.done.wait [#allocation3], 256  }
  0x1b   :  { %320 = vsyncadd [#allocation3], 4294967040 }
  0x1c   :  { %321 = dma.done.wait [#allocation6], 1024  }
  0x1d   :  { %322 = vsyncadd [#allocation6], 4294966272  ;;  %v331_v0 = vmov 0.0   ;;  %vm332_vm0 = vmmov 0   ;;  %v41_v1 = vld [vmem:[#allocation2] sm:$0xff]  ;;  %v42_v2 = vld [vmem:[#allocation2 + $0x8] sm:$0xff] }
  0x1e   :  { %209 = vmatprep.subr.bf16.mxu0 %v331_v0  ;;  %225 = vmatprep.mubr.msk.bf16.mxu0 %vm332_vm0, %v331_v0  ;;  %v238_v3 = vpack.i.bf16 %v42_v2, %v41_v1  ;;  %v243_v4 = vld [vmem:[#allocation5 + $0x38] sm:$0xff]   ;;  %v244_v5 = vld [vmem:[#allocation5 + $0x30] sm:$0xff]   ;;  %v245_v6 = vld [vmem:[#allocation5 + $0x28] sm:$0xff]   ;;  %v44_v12 = vsub.f32 0.0, %v42_v2  ;;  %v43_v13 = vsub.f32 0.0, %v41_v1  ;;  %vm63_vm1 = vcmask 523264  }
  0x1f   :  { %210 = vmatpush3.bf16.msra.mxu0 %v243_v4  ;;  %v246_v7 = vld [vmem:[#allocation5 + $0x20] sm:$0xff]   ;;  %v247_v8 = vld [vmem:[#allocation5 + $0x18] sm:$0xff]   ;;  %v248_v9 = vld [vmem:[#allocation5 + $0x10] sm:$0xff]   ;;  %s333_s0 = smov [#allocation7]  }
  0x20   :  { %239 = vrot.lane.b32.xlu0 %v238_v3, %s329_s19  ;;  %211 = vmatprep.subr.bf16.mxu0 %v331_v0  ;;  %v249_v10 = vld [vmem:[#allocation5 + $0x8] sm:$0xff]   ;;  %v250_v11 = vld [vmem:[#allocation5] sm:$0xff]   ;;  %v47_v14 = vmul.f32 1.442695, %v44_v12  ;;  %v45_v15 = vmul.f32 1.442695, %v43_v13 }
  0x21   :  { %s179_s1 = sshll.u32 %s333_s0, 4  ;;  %s180_s1 = int_to_ptr.vmem [resolvable:$true] %s179_s1 }
  0x22   :  { %251 = vpow2.f32 %v47_v14  ;;  %s299_s23 = scalar_lea.vmem %s180_s1, 256  ;;  %p304_p11 = scmp.lt.s32.totalorder %s180_s1, %s180_s1 }
  0x23   :  { %212 = vmatpush3.bf16.msra.mxu0 %v244_v5  ;;  %253 = vpow2.f32 %v45_v15  ;;  %p300_p10 = scmp.ne.s32.totalorder %s180_s1, %s299_s23  ;;  %p305_p12 = scmp.lt.s32.totalorder %s299_s23, %s299_s23 }
  0x24   :  { %213 = vmatprep.subr.bf16.mxu0 %v331_v0 }
  0x25   :  { %p306_p13 = por %p305_p12, %p304_p11 }
  0x27   :  { %214 = vmatpush3.bf16.msra.mxu0 %v245_v6  ;;  %p307_p0 = pnand %p306_p13, %p300_p10 }
  0x28   :  { %215 = vmatprep.subr.bf16.mxu0 %v331_v0 }
  0x2b   :  { %216 = vmatpush3.bf16.msra.mxu0 %v246_v7 }
  0x2c   :  { %217 = vmatprep.subr.bf16.mxu0 %v331_v0 }
  0x2f   :  { %218 = vmatpush3.bf16.msra.mxu0 %v247_v8  ;;  %v252_v16 = vpop.eup %251 }
  0x30   :  { %219 = vmatprep.subr.bf16.mxu0 %v331_v0  ;;  %v254_v17 = vpop.eup %253  ;;  %v50_v18 = vadd.f32 1.0, %v252_v16 }
  0x31   :  { %v49_v19 = vadd.f32 1.0, %v254_v17 }
  0x32   :  { %255 = vrcp.f32 %v50_v18 }
  0x33   :  { %220 = vmatpush3.bf16.msra.mxu0 %v248_v9  ;;  %257 = vrcp.f32 %v49_v19 }
  0x34   :  { %221 = vmatprep.subr.bf16.mxu0 %v331_v0 }
  0x37   :  { %222 = vmatpush3.bf16.msra.mxu0 %v249_v10 }
  0x38   :  { %223 = vmatprep.subr.bf16.mxu0 %v331_v0 }
  0x3b   :  { %224 = vmatpush3.bf16.msra.mxu0 %v250_v11 }
  0x3f   :  { %v256_v20 = vpop.eup %255 }
  0x40   :  { %v258_v21 = vpop.eup %257  ;;  %v54_v22 = vmul.f32 %v256_v20, %v42_v2 }
  0x41   :  { %v53_v23 = vmul.f32 %v258_v21, %v41_v1 }
  0x92   :  { %v240_v24 = vpop.permute.xlu0 %239 }
  0x93   :  { %v242_v25 = vunpack.i.h.bf16 %v240_v24  ;;  %v241_v26 = vunpack.i.l.bf16 %v240_v24 }
  0x95   :  { %v64_v27 = vsel %vm63_vm1, %v53_v23, %v241_v26  ;;  %v65_v28 = vsel %vm63_vm1, %v54_v22, %v242_v25 }
  0x96   :  { %v66_v29 = vpack.c.bf16 %v65_v28, %v64_v27 }
  0x98   :  { %226 = vmatmul.mubr.bf16.vlgmr.msra.gmra.mxu0 %v66_v29 }
 0x158   :  { %v165_v30 = vpop.f32.mrf.mxu0 }
 0x159   :  { %172 = vst [vmem:[#allocation7] sm:$0xff] %v165_v30 }
 0x15a   :  { %v227_v31 = vpop.f32.mrf.mxu0 }
 0x15c   :  { %v168_v32 = vpop.f32.mrf.mxu0 }
 0x15d   :  { %173 = vst [vmem:[#allocation7 + $0x8] sm:$0xff] %v168_v32 }
 0x15e   :  { %v228_v33 = vpop.f32.mrf.mxu0 }
 0x15f   :  { %310 = shalt.err (!%p307_p0)
}
 0x160   :  { %185 = dma.vmem_to_hbm [thread:$0]  %s180_s1, 256, %s366_s2, [#allocation4], %s326_s12, %s326_s12, %s327_s13  }
 0x161   :  { %323 = dma.done.wait [#allocation4], 256  }
 0x162   :  { %324 = vsyncadd [#allocation4], 4294967040 }
 0x163   :  { %189 = vsyncpa [#allocation3], 1 }
 0x164   :  { %190 = vsyncpa [#allocation6], 1 }
 0x165   :  { %191 = vsyncpa [#allocation4], 1 }

</bundles_post_ra>
